<compile_context>
chip_gen: v7x
topology: tpu7x:2x2x1
jax: 0.10.0
libtpu: 0.0.40
codegen_flags: <defaults>
</compile_context>

<pallas_src>
import jax
import jax.numpy as jnp
from jax import lax
from jax.experimental import pallas as pl
from jax.experimental.pallas import tpu as pltpu


def _mlp_softmax2_kernel(xT_ref, w1_ref, b1_ref, w2_ref, b2_ref, oT_ref):
    # Batch is the lane axis; features/classes live on sublanes.
    x = xT_ref[...].astype(jnp.float32)                                   # (15, T)
    h = jnp.dot(w1_ref[...], x, preferred_element_type=jnp.float32)       # (10, T)
    h = jnp.maximum(h + b1_ref[...], 0.0)                                 # bias bcast over lanes + ReLU
    logits = jnp.dot(w2_ref[...], h, preferred_element_type=jnp.float32)  # (2, T)
    logits = logits + b2_ref[...]

    # 2-class softmax == sigmoid of the logit difference (no cross-lane reductions, one exp).
    d = logits[0:1, :] - logits[1:2, :]                                   # (1, T) = l0 - l1
    p1 = 1.0 / (1.0 + jnp.exp(d))                                         # sigmoid(l1 - l0)

    # Single lane-dense (2, T) store: row 0 -> p0 = 1 - p1, row 1 -> p1.
    C, T = oT_ref.shape
    row = lax.broadcasted_iota(jnp.int32, (C, T), 0)
    oT_ref[...] = jnp.where(row == 0, 1.0 - p1, p1)


def net_forward_pallas(x, w1, b1, w2, b2, *, tile_b=32768):
    """Pallas forward pass.

    x:  (B, 15)  any float dtype (cast to f32 in-kernel, matching `.float()`)
    w1: (10, 15) = PyTorch fc1.weight layout [out, in]
    b1: (10, 1)  = fc1.bias[:, None]
    w2: (2, 10)  = PyTorch fc2.weight layout
    b2: (2, 1)   = fc2.bias[:, None]
    returns (B, 2) float32 softmax probabilities.
    """
    B, F = x.shape
    H, C = w1.shape[0], w2.shape[0]

    # Lane tiles must be multiples of 128. Use big tiles to amortize per-grid-step
    # overhead, but never bigger than the 128-padded batch (avoids padding waste).
    b_pad128 = ((B + 127) // 128) * 128
    tile_b = ((max(int(tile_b), 128) + 127) // 128) * 128
    tile_b = min(tile_b, b_pad128)
    nb = pl.cdiv(B, tile_b)
    Bp = nb * tile_b

    # Layout plumbing: present batch as the lane axis; pad to a whole number of tiles.
    # (transpose + pad fuse into a single XLA pass over x)
    xT = x.T
    if Bp != B:
        xT = jnp.pad(xT, ((0, 0), (0, Bp - B)))

    outT = pl.pallas_call(
        _mlp_softmax2_kernel,
        out_shape=jax.ShapeDtypeStruct((C, Bp), jnp.float32),
        grid=(nb,),
        in_specs=[
            pl.BlockSpec((F, tile_b), lambda i: (0, i)),   # x tile, streamed over batch
            pl.BlockSpec((H, F), lambda i: (0, 0)),        # weights/biases: constant block,
            pl.BlockSpec((H, 1), lambda i: (0, 0)),        # stay resident in VMEM
            pl.BlockSpec((C, H), lambda i: (0, 0)),
            pl.BlockSpec((C, 1), lambda i: (0, 0)),
        ],
        out_specs=pl.BlockSpec((C, tile_b), lambda i: (0, i)),
        compiler_params=pltpu.CompilerParams(
            dimension_semantics=("parallel",),  # shard batch axis across TCs on v7x
        ),
    )(xT, w1, b1, w2, b2)

    return outT[:, :B].T                                   # back to (B, 2)


def reference_forward(x, w1, b1, w2, b2):
    """Plain fused-XLA forward (also the small-batch fast path)."""
    h = jnp.maximum(x.astype(jnp.float32) @ w1.T + b1.T, 0.0)
    logits = h @ w2.T + b2.T
    return jax.nn.softmax(logits, axis=1)


def net_forward(x, w1, b1, w2, b2, *, tile_b=32768, min_pallas_batch=512):
    """Dispatcher: tiny batches skip Pallas (launch/DMA overhead dominates)."""
    if x.shape[0] < min_pallas_batch:
        return reference_forward(x, w1, b1, w2, b2)
    return net_forward_pallas(x, w1, b1, w2, b2, tile_b=tile_b)


def init_params(key):
    """Deterministic init mimicking nn.Linear uniform(-1/sqrt(fan_in), +)."""
    k1, k2, k3, k4 = jax.random.split(key, 4)
    bound1 = 1.0 / jnp.sqrt(15.0)
    bound2 = 1.0 / jnp.sqrt(10.0)
    w1 = jax.random.uniform(k1, (10, 15), jnp.float32, -bound1, bound1)  # [out, in]
    b1 = jax.random.uniform(k2, (10, 1), jnp.float32, -bound1, bound1)
    w2 = jax.random.uniform(k3, (2, 10), jnp.float32, -bound2, bound2)
    b2 = jax.random.uniform(k4, (2, 1), jnp.float32, -bound2, bound2)
    return w1, b1, w2, b2


if __name__ == "__main__":
    key = jax.random.PRNGKey(0)
    kx, kp = jax.random.split(key)

    B = 1000  # not a multiple of the tile -> exercises padding + multi-step grid
    x = jax.random.normal(kx, (B, 15), jnp.float32)
    w1, b1, w2, b2 = init_params(kp)

    # Small tile so the 1-D batch grid actually runs several pipelined steps.
    out = net_forward_pallas(x, w1, b1, w2, b2, tile_b=256)
    out = jax.block_until_ready(out)

    ref = reference_forward(x, w1, b1, w2, b2)
    assert out.shape == (B, 2)
    assert jnp.allclose(out, ref, atol=1e-5, rtol=1e-5)
    assert jnp.allclose(jnp.sum(out, axis=1), jnp.ones((B,)), atol=1e-5)

    # Also exercise the default (large, clamped) tile path and the dispatcher.
    out2 = jax.block_until_ready(net_forward(x, w1, b1, w2, b2))
    assert jnp.allclose(out2, ref, atol=1e-5, rtol=1e-5)

    print("KERNEL_OK")
</pallas_src>

<mosaic_0001>
module attributes {stable_mosaic.version = 11 : i64} {
  func.func @_mlp_softmax2_kernel(%arg0: i32, %arg1: memref<15x256xf32, #tpu.memory_space<vmem>>, %arg2: memref<10x15xf32, #tpu.memory_space<vmem>>, %arg3: memref<10x1xf32, #tpu.memory_space<vmem>>, %arg4: memref<2x10xf32, #tpu.memory_space<vmem>>, %arg5: memref<2x1xf32, #tpu.memory_space<vmem>>, %arg6: memref<2x256xf32, #tpu.memory_space<vmem>>) attributes {dimension_semantics = [#tpu.dimension_semantics<parallel>], iteration_bounds = array<i64: 4>, scalar_prefetch = 0 : i64, scratch_operands = 0 : i64, tpu.core_type = #tpu.core_type<tc>, window_params = [{transform_indices = @transform_0, window_bounds = array<i64: 15, 256>}, {pipeline_mode = #tpu.pipeline_mode<synchronous>, transform_indices = @transform_1, window_bounds = array<i64: 10, 15>}, {pipeline_mode = #tpu.pipeline_mode<synchronous>, transform_indices = @transform_2, window_bounds = array<i64: 10, 1>}, {pipeline_mode = #tpu.pipeline_mode<synchronous>, transform_indices = @transform_3, window_bounds = array<i64: 2, 10>}, {pipeline_mode = #tpu.pipeline_mode<synchronous>, transform_indices = @transform_4, window_bounds = array<i64: 2, 1>}, {transform_indices = @transform_5, window_bounds = array<i64: 2, 256>}]} {
    %c0 = arith.constant 0 : index
    %c0_0 = arith.constant 0 : index
    %0 = vector.load %arg1[%c0, %c0_0] : memref<15x256xf32, #tpu.memory_space<vmem>>, vector<15x256xf32>
    %c0_1 = arith.constant 0 : index
    %c0_2 = arith.constant 0 : index
    %1 = vector.load %arg2[%c0_1, %c0_2] : memref<10x15xf32, #tpu.memory_space<vmem>>, vector<10x15xf32>
    %cst = arith.constant dense<0.000000e+00> : vector<10x256xf32>
    %2 = tpu.matmul %1, %0, %cst {dimension_numbers = #tpu.dot_dimension_numbers<[1], [0], [0], [1], [0, 0, 1, 1], [], []>} : vector<10x15xf32>, vector<15x256xf32>, vector<10x256xf32> -> vector<10x256xf32>
    %c0_3 = arith.constant 0 : index
    %c0_4 = arith.constant 0 : index
    %3 = vector.load %arg3[%c0_3, %c0_4] : memref<10x1xf32, #tpu.memory_space<vmem>>, vector<10x1xf32>
    %4 = vector.broadcast %3 : vector<10x1xf32> to vector<10x256xf32>
    %5 = arith.addf %2, %4 : vector<10x256xf32>
    %cst_5 = arith.constant 0.000000e+00 : f32
    %6 = vector.broadcast %cst_5 : f32 to vector<10x256xf32>
    %7 = arith.maximumf %5, %6 : vector<10x256xf32>
    %c0_6 = arith.constant 0 : index
    %c0_7 = arith.constant 0 : index
    %8 = vector.load %arg4[%c0_6, %c0_7] : memref<2x10xf32, #tpu.memory_space<vmem>>, vector<2x10xf32>
    %cst_8 = arith.constant dense<0.000000e+00> : vector<2x256xf32>
    %9 = tpu.matmul %8, %7, %cst_8 {dimension_numbers = #tpu.dot_dimension_numbers<[1], [0], [0], [1], [0, 0, 1, 1], [], []>} : vector<2x10xf32>, vector<10x256xf32>, vector<2x256xf32> -> vector<2x256xf32>
    %c0_9 = arith.constant 0 : index
    %c0_10 = arith.constant 0 : index
    %10 = vector.load %arg5[%c0_9, %c0_10] : memref<2x1xf32, #tpu.memory_space<vmem>>, vector<2x1xf32>
    %11 = vector.broadcast %10 : vector<2x1xf32> to vector<2x256xf32>
    %12 = arith.addf %9, %11 : vector<2x256xf32>
    %13 = vector.extract_strided_slice %12 {offsets = [0, 0], sizes = [1, 256], strides = [1, 1]} : vector<2x256xf32> to vector<1x256xf32>
    %14 = vector.extract_strided_slice %12 {offsets = [1, 0], sizes = [1, 256], strides = [1, 1]} : vector<2x256xf32> to vector<1x256xf32>
    %15 = arith.subf %13, %14 : vector<1x256xf32>
    %16 = math.exp %15 : vector<1x256xf32>
    %cst_11 = arith.constant 1.000000e+00 : f32
    %17 = vector.broadcast %cst_11 : f32 to vector<1x256xf32>
    %18 = arith.addf %17, %16 : vector<1x256xf32>
    %cst_12 = arith.constant 1.000000e+00 : f32
    %19 = vector.broadcast %cst_12 : f32 to vector<1x256xf32>
    %20 = arith.divf %19, %18 : vector<1x256xf32>
    %21 = tpu.iota {dimensions = array<i32: 0>} : vector<2x256xi32>
    %c0_i32 = arith.constant 0 : i32
    %22 = vector.broadcast %c0_i32 : i32 to vector<2x256xi32>
    %23 = arith.cmpi eq, %21, %22 : vector<2x256xi32>
    %cst_13 = arith.constant 1.000000e+00 : f32
    %24 = vector.broadcast %cst_13 : f32 to vector<1x256xf32>
    %25 = arith.subf %24, %20 : vector<1x256xf32>
    %26 = vector.shape_cast %25 : vector<1x256xf32> to vector<1x256xf32>
    %27 = vector.broadcast %26 : vector<1x256xf32> to vector<2x256xf32>
    %28 = vector.shape_cast %20 : vector<1x256xf32> to vector<1x256xf32>
    %29 = vector.broadcast %28 : vector<1x256xf32> to vector<2x256xf32>
    %30 = arith.select %23, %27, %29 : vector<2x256xi1>, vector<2x256xf32>
    %c0_14 = arith.constant 0 : index
    %c0_15 = arith.constant 0 : index
    %31 = vector.load %arg6[%c0_14, %c0_15] : memref<2x256xf32, #tpu.memory_space<vmem>>, vector<2x256xf32>
    tpu.vector_store %arg6[%c0_14, %c0_15], %30 {strides = array<i32>} : memref<2x256xf32, #tpu.memory_space<vmem>>, vector<2x256xf32>,
    return
  }
  func.func @transform_0(%arg0: i32) -> (i32, i32) {
    %c0_i32 = arith.constant 0 : i32
    %c0_i32_0 = arith.constant 0 : i32
    return %c0_i32, %arg0 : i32, i32
  }
  func.func @transform_1(%arg0: i32) -> (i32, i32) {
    %c0_i32 = arith.constant 0 : i32
    %c0_i32_0 = arith.constant 0 : i32
    %c0_i32_1 = arith.constant 0 : i32
    return %c0_i32, %c0_i32_0 : i32, i32
  }
  func.func @transform_2(%arg0: i32) -> (i32, i32) {
    %c0_i32 = arith.constant 0 : i32
    %c0_i32_0 = arith.constant 0 : i32
    %c0_i32_1 = arith.constant 0 : i32
    return %c0_i32, %c0_i32_0 : i32, i32
  }
  func.func @transform_3(%arg0: i32) -> (i32, i32) {
    %c0_i32 = arith.constant 0 : i32
    %c0_i32_0 = arith.constant 0 : i32
    %c0_i32_1 = arith.constant 0 : i32
    return %c0_i32, %c0_i32_0 : i32, i32
  }
  func.func @transform_4(%arg0: i32) -> (i32, i32) {
    %c0_i32 = arith.constant 0 : i32
    %c0_i32_0 = arith.constant 0 : i32
    %c0_i32_1 = arith.constant 0 : i32
    return %c0_i32, %c0_i32_0 : i32, i32
  }
  func.func @transform_5(%arg0: i32) -> (i32, i32) {
    %c0_i32 = arith.constant 0 : i32
    %c0_i32_0 = arith.constant 0 : i32
    return %c0_i32, %arg0 : i32, i32
  }
}

</mosaic_0001>

<bundles_post_ra>
// kernel: tpu_custom_call.1
= control target key start
LH: loop header
LB: loop body
LE: loop exit
PB: predicated region body
PF: predicated region fallthrough
CT: control target
= control target key end

     0   :  { %10 = vsyncpa [#allocation3], 0  ;;  %s1000_s0 = inlined_call_operand.hbm [shape: f32[15,1024], index: 0, kind: input, shape index: {}]   ;;  %s1001_s1 = inlined_call_operand.vmem [shape: f32[10,15], index: 1, kind: input, shape index: {}]   ;;  %s1002_s2 = inlined_call_operand.vmem [shape: f32[10,1], index: 2, kind: input, shape index: {}]   ;;  %s1003_s3 = inlined_call_operand.vmem [shape: f32[2,10], index: 3, kind: input, shape index: {}]   ;;  %s1004_s4 = inlined_call_operand.vmem [shape: f32[2,1], index: 4, kind: input, shape index: {}]   ;;  %s1005_s5 = inlined_call_operand.hbm [shape: f32[2,1024], index: 5, kind: output, shape index: {}]  }
   0x1   :  { %12 = vsyncpa [#allocation3 + $0x1], 0 }
   0x2   :  { %13 = vsyncpa [#allocation4], 0 }
   0x3   :  { %15 = vsyncpa [#allocation4 + $0x1], 0  ;;  %s819_s18 = smov 0   ;;  %s821_s19 = smov 0  }
   0x4   :  { %s823_s20 = smov 0   ;;  %s825_s21 = smov 0  }
   0x5 LB: > { %s840_s22 = sadd.s32 4294967295, %s779_s21   ;;  %s585_s23 = sadd.s32 4294967294, %s779_s21   ;;  %s779_s21 = sphi %s825_s21, %s1018_s21   ;;  %s775_s20 = sphi %s823_s20, %s1017_s20   ;;  %s771_s19 = sphi %s821_s19, %s1016_s19   ;;  %s767_s18 = sphi %s819_s18, %s1015_s18  }
   0x6   : > { %s844_s24 = sadd.s32 1, %s779_s21   ;;  %s28_s25 = sadd.s32 1, %s775_s20 }
   0x7   : > { %s25_s26 = ssub.s32 %s779_s21, %s844_s24  ;;  %p35_p0 = scmp.ne.s32.totalorder %s775_s20, %s771_s19 }
   0x8   : > { %p26_p1 = scmp.eq.s32.totalorder %s25_s26, 0  ;;  %p36_p2 = scmp.eq.s32.totalorder %s779_s21, 0 }
   0x9   : > { %p41_p3 = scmp.ne.s32.totalorder %s771_s19, %s767_s18  ;;  %p42_p4 = scmp.eq.s32.totalorder %s840_s22, 0 }
   0xa   : > { %s856_s27 = scalar_select %p26_p1, %s775_s20, %s28_s25  }
   0xb   : > { %p858_p5 = por %p36_p2, %p35_p0  ;;  %p862_p6 = por %p42_p4, %p41_p3 }
   0xc   : > { %p149_p7 = scmp.eq.s32.totalorder %s840_s22, 3  ;;  %p155_p8 = scmp.eq.s32.totalorder %s585_s23, 3 }
   0xd   : > { %p633_p9 = scmp.lt.s32.totalorder %s779_s21, 4  ;;  %s187_s7 = sand.u32 1, %s775_s20  }
   0xe   : > { %p868_p10 = por %p149_p7, %p35_p0  ;;  %p872_p11 = por %p155_p8, %p41_p3 }
   0xf   : > { %s607_s8 = sshll.u32 %s779_s21, 8  ;;  %s588_s9 = sshll.u32 %s187_s7, 5 }
  0x10   : > { %s1009_s30 = scalar_select %p868_p10, 1, 0 }
  0x11   : > { %s1010_s6 = scalar_select %p872_p11, 1, 0 }
  0x12   : > { %s881_s12 = scalar_lea.hbm %s1000_s0, %s607_s8  ;;  %s191_s13 = scalar_lea.vmem [#allocation2], %s588_s9 }
  0x13   : > { %s198_s14 = sshll.u32 %s191_s13, 4  ;;  %p885_p12 = pnand %p633_p9, %p858_p5  ;;  %s889_s14 = int_to_ptr.vmem [resolvable:$true] %s198_s14 }
  0x14   : > { %s892_s16 = scalar_lea.sflag [#allocation3], %s187_s7  ;;  %s683_s17 = scalar_lea.hbm %s881_s12, 512 }
  0x15   : > { %p684_p0 = scmp.ne.s32.totalorder %s881_s12, %s683_s17  ;;  %p685_p1 = pneg %p885_p12 }
  0x16   : > { %s688_s26 = scalar_lea.hbm %s1000_s0, 2048  ;;  %p689_p4 = scmp.lt.u32.totalorder %s881_s12, %s1000_s0 }
  0x17   : > { %p686_p2 = pnand %p685_p1, %p684_p0  ;;  %p690_p5 = scmp.lt.u32.totalorder %s688_s26, %s683_s17 }
  0x18   : > { %p692_p8 = scmp.lt.u32.totalorder %s683_s17, %s881_s12 }
  0x19   : > { %p687_p3 = pneg %p686_p2  ;;  %p691_p7 = por %p690_p5, %p689_p4 }
  0x1b   : > { %p693_p9 = por %p692_p8, %p691_p7 }
  0x1d   : > { %p694_p13 = pnand %p693_p9, %p687_p3 }
  0x1f   : > { %697 = shalt.err (!%p694_p13)
}
  0x20   : > { %s698_s7 = scalar_lea.vmem %s889_s14, 512  ;;  %s781_s9 = smov [#allocation2]  }
  0x21   : > { %p699_p0 = scmp.ne.s32.totalorder %s889_s14, %s698_s7  ;;  %s703_s10 = sshll.u32 %s781_s9, 4  ;;  %s704_s10 = int_to_ptr.vmem [resolvable:$false] %s703_s10 }
  0x22   : > { %s705_s11 = scalar_lea.vmem %s704_s10, 1024  ;;  %p706_p10 = scmp.lt.s32.totalorder %s889_s14, %s704_s10 }
  0x23   : > { %p701_p2 = pnand %p699_p0, %p685_p1  ;;  %p707_p4 = scmp.lt.s32.totalorder %s705_s11, %s698_s7 }
  0x25   : > { %p702_p11 = pneg %p701_p2  ;;  %p708_p5 = por %p707_p4, %p706_p10 }
  0x27   : > { %p709_p7 = pnand %p708_p5, %p702_p11 }
  0x29   : > { %712 = shalt.err (!%p709_p7)
}
  0x2a   : > { %s782_s13 = smov 1024   ;;  %s783_s17 = smov 256  }
  0x2b   : > { %s784_s23 = smov 16   ;;  %p206_p13 = scmp.lt.s32.totalorder %s779_s21, 5 }
  0x2c   : > { %628 = dma.hbm_to_vmem [thread:$0]  (!%p885_p12), %s881_s12, 512, %s889_s14, %s892_s16, %s782_s13, %s783_s17, %s784_s23  }
  0x2d   : > { %p1012_p1 = scmp.ge.s32.totalorder %s779_s21, 1 }
  0x2f   : > { %p207_p3 = pnand %p1012_p1, %p206_p13 }
  0x30   : > { %s924_s25 = sand.u32 (!%p207_p3), 1, %s771_s19  }
  0x31   : > { %210 = sbr.rel (%p207_p3) target bundleno = 558 (0x22e), region = 40  ;;  %s592_s26 = sshll.u32 (!%p207_p3), %s924_s25, 5 }
  0x32   : > { %s213_s28 = scalar_lea.sflag (!%p207_p3), [#allocation3], %s924_s25  ;;  %s216_s8 = scalar_lea.vmem (!%p207_p3), [#allocation2], %s592_s26 }
  0x38   : > { %758 = dma.done.wait (%p862_p6), %s213_s28, 512  }
  0x39   : > { %760 = vsyncadd (%p862_p6), %s213_s28, 4294966784  ;;  %v785_v0 = vmov 0.0   ;;  %v786_v1 = vmov 0   ;;  %vm270_vm0 = vcmask 1046528   ;;  %vm787_vm1 = vmmov 1   ;;  %v246_v2 = vld [vmem:[%s216_s8 + $0x8] sm:$0xff] }
  0x3a   : > { %341 = vmatprep.mubr.f32.mxu0 %v785_v0  ;;  %440 = vmatprep.mubr.f32.mxu1 %v785_v0  ;;  %vm610_vm2 = vmpackc.low %vm270_vm0, %vm787_vm1  ;;  %v248_v3 = vld [vmem:[%s216_s8 + $0x18] sm:$0x7f]  ;;  %v245_v4 = vld [vmem:[%s216_s8] sm:$0xff]  ;;  %vm263_vm3 = vcmask 121856   ;;  %vm369_vm4 = vcmask 1041408   ;;  %vm365_vm6 = vcmask 80896   ;;  %v465_v45 = vlaneseq }
  0x3b   : > { %673 = vset.pattern.permute.xlu0 %v786_v1  ;;  %674 = vset.pattern.permute.xlu1 %v786_v1  ;;  %v609_v5 = vpack.c.bf16 %v248_v3, %v246_v2  ;;  %v247_v6 = vld [vmem:[%s216_s8 + $0x10] sm:$0x7f]  ;;  %v251_v8 = vld [vmem:[%s1002_s2] sm:$0xff]  ;;  %v252_v10 = vld [vmem:[%s1002_s2 + $0x8] sm:$0x3]  ;;  %s593_s26 = sshll.u32 %s924_s25, 2 }
  0x3c   : > { %v612_v7 = vpack.c.bf16 %v247_v6, %v245_v4  ;;  %255 = vperm.xlu0 %673, %v251_v8   ;;  %v249_v9 = vld [vmem:[%s1001_s1] sm:$0xff]  ;;  %v250_v11 = vld [vmem:[%s1001_s1 + $0x8] sm:$0x3]  ;;  %vm616_vm5 = vmpackc.low %vm369_vm4, %vm787_vm1  ;;  %v466_v46 = vshrl.u32 %v465_v45, 7  ;;  %s608_s28 = sshll.u32 %s840_s22, 6  ;;  %s242_s8 = scalar_lea.vmem [#allocation5], %s593_s26 }
  0x3d   : > { %611 = vmatprep.subr.msk.bf16.mxu0 %vm610_vm2, %v609_v5  ;;  %v359_v12 = vld [vmem:[%s1004_s4] sm:$0x3]  ;;  %s515_s12 = sshll.u32 %s242_s8, 4  ;;  %s957_s15 = scalar_lea.hbm %s1005_s5, %s608_s28  ;;  %s959_s12 = int_to_ptr.vmem [resolvable:$true] %s515_s12 }
  0x3e   : > { %614 = vmatpush1.bf16.msk.msra.mxu0 %vm610_vm2, %v612_v7  ;;  %362 = vperm.xlu1 %674, %v359_v12   ;;  %v358_v29 = vld [vmem:[%s1003_s3] sm:$0x3]  ;;  %v472_v47 = vsub.s32 0, %v466_v46  ;;  %vm467_vm7 = vcmp.eq.s32.totalorder %v466_v46, 0  ;;  %s501_s16 = scalar_lea.sflag [#allocation4], %s924_s25  ;;  %s713_s7 = scalar_lea.vmem %s959_s12, 64 }
  0x3f   : > { %p714_p6 = scmp.ne.s32.totalorder %s959_s12, %s713_s7  ;;  %p1013_p10 = scmp.ne.s32.totalorder %s1009_s30, 0 }
  0x40   : > { %260 = vperm.xlu0 %673, %v252_v10   ;;  %s788_s22 = smov [#allocation5]  }
  0x41   : > { %596 = vmatmul.mubr.msk.f32.vlgmr.msra.gmra.mrb[0].mxu0 %vm263_vm3, %v249_v9  ;;  %p715_p11 = pnand %p714_p6, %p1013_p10  ;;  %s717_s9 = sshll.u32 %s788_s22, 4  ;;  %s718_s9 = int_to_ptr.vmem [resolvable:$false] %s717_s9 }
  0x42   : > { %347 = vmatprep.mubr.f32.mxu0 %v785_v0  ;;  %s719_s10 = scalar_lea.vmem %s718_s9, 128  ;;  %p720_p8 = scmp.lt.s32.totalorder %s959_s12, %s718_s9 }
  0x43   : > { %p716_p12 = pneg %p715_p11  ;;  %p721_p9 = scmp.lt.s32.totalorder %s719_s10, %s713_s7 }
  0x45   : > { %597 = vmatmul.mubr.msk.f32.gmra.mrb[2].mxu0 %vm263_vm3, %v250_v11  ;;  %p722_p0 = por %p721_p9, %p720_p8 }
  0x47   : > { %p723_p2 = pnand %p722_p0, %p716_p12 }
  0xbb   : > { %v256_v13 = vpop.permute.xlu0 %255 }
  0xbd   : > { %v363_v30 = vpop.permute.xlu1 %362 }
  0xbf   : > { %v261_v17 = vpop.permute.xlu0 %260 }
 0x114   : > { %v343_v14 = vpop.f32.mrb[0].mxu0 }
 0x115   : > { %v345_v15 = vpop.f32.mrb[1].mxu0  ;;  %v344_v16 = vadd.f32 %v343_v14, %v256_v13 }
 0x116   : > { %v346_v18 = vadd.f32 %v345_v15, %v256_v13 }
 0x117   : > { %v354_v23 = vmax.f32 %v344_v16, 0.0 }
 0x118   : > { %v349_v19 = vpop.f32.mrb[2].mxu0  ;;  %v355_v25 = vmax.f32 %v346_v18, 0.0 }
 0x119   : > { %v350_v20 = vadd.f32 %v349_v19, %v261_v17  ;;  %v351_v21 = vpop.f32.mrb[3].mxu0 }
 0x11a   : > { %v352_v22 = vadd.f32 %v351_v21, %v261_v17 }
 0x11b   : > { %v356_v24 = vmax.f32 %v350_v20, 0.0 }
 0x11c   : > { %v357_v26 = vmax.f32 %v352_v22, 0.0 }
 0x11d   : > { %v618_v27 = vpack.c.bf16 %v356_v24, %v354_v23 }
 0x11e   : > { %v615_v28 = vpack.c.bf16 %v357_v26, %v355_v25 }
 0x120   : > { %617 = vmatprep.subr.msk.bf16.mxu1 %vm616_vm5, %v615_v28 }
 0x121   : > { %620 = vmatpush1.bf16.msk.msra.mxu1 %vm616_vm5, %v618_v27 }
 0x124   : > { %600 = vmatmul.mubr.msk.f32.vlgmr.msra.gmra.mrb[0].mxu1 %vm365_vm6, %v358_v29 }
 0x1f7   : > { %v442_v31 = vpop.f32.mrb[0].mxu1 }
 0x1f8   : > { %v443_v32 = vadd.f32 %v442_v31, %v363_v30  ;;  %v444_v33 = vpop.f32.mrb[1].mxu1 }
 0x1f9   : > { %v445_v34 = vadd.f32 %v444_v33, %v363_v30 }
 0x1fa   : > { %v449_v35 = vrot.slane %v443_v32, 1 }
 0x1fb   : > { %v450_v36 = vrot.slane %v445_v34, 1 }
 0x1fc   : > { %v453_v37 = vsub.f32 %v443_v32, %v449_v35 }
 0x1fd   : > { %v454_v38 = vsub.f32 %v445_v34, %v450_v36 }
 0x1fe   : > { %v455_v39 = vmul.f32 1.442695, %v453_v37 }
 0x1ff   : > { %v457_v40 = vmul.f32 1.442695, %v454_v38 }
 0x200   : > { %675 = vpow2.f32 %v455_v39 }
 0x201   : > { %677 = vpow2.f32 %v457_v40 }
 0x20a   : > { %v676_v41 = vpop.eup %675 }
 0x20b   : > { %v678_v42 = vpop.eup %677  ;;  %v459_v43 = vadd.f32 1.0, %v676_v41 }
 0x20c   : > { %v460_v44 = vadd.f32 1.0, %v678_v42 }
 0x20d   : > { %679 = vrcp.f32 %v459_v43 }
 0x20e   : > { %681 = vrcp.f32 %v460_v44 }
 0x217   : > { %v680_v48 = vpop.eup %679 }
 0x218   : > { %v682_v49 = vpop.eup %681  ;;  %v468_v50 = vsub.f32 1.0, %v680_v48  ;;  %v481_v53 = vrot.slane %v680_v48, %v472_v47 }
 0x219   : > { %v469_v51 = vsub.f32 1.0, %v682_v49  ;;  %v485_v55 = vrot.slane %v682_v49, %v472_v47 }
 0x21a   : > { %v473_v52 = vrot.slane %v468_v50, %v472_v47 }
 0x21b   : > { %v477_v54 = vrot.slane %v469_v51, %v472_v47 }
 0x21c   : > { %v486_v56 = vsel %vm467_vm7, %v473_v52, %v481_v53 }
 0x21d   : > { %v487_v57 = vsel %vm467_vm7, %v477_v54, %v485_v55 }
 0x21e   : > { %v490_v58 = vcombine.low %v486_v56, %v487_v57 }
 0x220   : > { %601 = vst.sshfl [vmem:[%s242_s8] sm:$0x33 pattern:$0x76325410] %v490_v58 }
 0x221   : > { %726 = shalt.err (!%p723_p2)
}
 0x222   : > { %s727_s25 = scalar_lea.hbm %s957_s15, 64  ;;  %s731_s17 = scalar_lea.hbm %s1005_s5, 256 }
 0x223   : > { %p728_p4 = scmp.ne.s32.totalorder %s957_s15, %s727_s25  ;;  %p732_p13 = scmp.lt.u32.totalorder %s957_s15, %s1005_s5 }
 0x224   : > { %p733_p1 = scmp.lt.u32.totalorder %s731_s17, %s727_s25  ;;  %p735_p6 = scmp.lt.u32.totalorder %s727_s25, %s957_s15 }
 0x225   : > { %p729_p5 = pnand %p728_p4, %p1013_p10 }
 0x226   : > { %p734_p3 = por %p733_p1, %p732_p13 }
 0x227   : > { %p730_p7 = pneg %p729_p5 }
 0x228   : > { %p736_p11 = por %p735_p6, %p734_p3 }
 0x22a   : > { %p737_p12 = pnand %p736_p11, %p730_p7 }
 0x22c   : > { %740 = shalt.err (!%p737_p12)
}
 0x22d   : > { %623 = dma.vmem_to_hbm [thread:$0]  (%p1013_p10), %s959_s12, 64, %s957_s15, %s501_s16  }
 0x22e PF: > { %p634_p8 = scmp.ge.s32.totalorder %s779_s21, 2  ;;  %s527_s28 = sand.u32 1, %s767_s18  }
 0x22f   : > { %p1014_p9 = scmp.ne.s32.totalorder %s1010_s6, 0  ;;  %s528_s8 = scalar_lea.sflag [#allocation4], %s527_s28 }
 0x231   : > { %p630_p0 = pnand %p634_p8, %p1014_p9 }
 0x233   : > { %762 = dma.done.wait (!%p630_p0), %s528_s8, 64  }
 0x234   : > { %764 = vsyncadd (!%p630_p0), %s528_s8, 4294967232  ;;  %p18_p2 = scmp.ge.s32.totalorder %s844_s24, 6   ;;  %s1015_s18 = smov %s771_s19 }
 0x235   : > { %s1016_s19 = smov %s775_s20  ;;  %s1017_s20 = smov %s856_s27 }
 0x236   : > { %s1018_s21 = smov %s844_s24  ;;  %20 = sbr.rel (!%p18_p2) target bundleno = 5 (0x5), region = 85 }
 0x23d   :  { %533 = vsyncpa [#allocation3], 1 }
 0x23e   :  { %535 = vsyncpa [#allocation3 + $0x1], 1 }
 0x23f   :  { %536 = vsyncpa [#allocation4], 1 }
 0x240   :  { %538 = vsyncpa [#allocation4 + $0x1], 1 }

</bundles_post_ra>
